<compile_context>
chip_gen: v7x
topology: tpu7x:2x2x1
jax: 0.10.0
libtpu: 0.0.40
codegen_flags: <defaults>
</compile_context>

<pallas_src>
import functools

import jax
import jax.numpy as jnp
import numpy as np
from jax.experimental import pallas as pl
from jax.experimental.pallas import tpu as pltpu


def _round_up(x, m):
    return (x + m - 1) // m * m


# ----------------------------- Pallas kernel ------------------------------ #
def _pareto_kernel(xi_ref, xv_ref, xp_ref, xn_ref,
                   wi_ref, bi_ref, wv_ref, bv_ref, wp_ref, bp_ref,
                   wn_ref, bn_ref, w2_ref, b2_ref, w3_ref, b3_ref,
                   out_ref, *, s_i, s_v, s_p, b_tile):
    """Fused forward for one batch tile (batch on lanes).

    x*_ref : (d_set, n_seg * b_tile)  dense features on sublanes,
                                      (segment, batch) flattened on lanes
    w*_ref : (e_set, d_set)           encoder weight (pre-transposed)
    b*_ref : (e_set, 1)               encoder bias (broadcast over lanes)
    w2_ref : (e2, e1)                 block-diag aggregators + ne identity
    w3_ref : (1, e2), b3: (1, 1)      predictor
    out_ref: (1, b_tile)              lane-dense sigmoid output row
    """

    def enc_sum(x_ref, w_ref, b_ref, n_seg):
        # relu(W x + b) for all segments in one MXU pass (lanes = seg*batch),
        # then torch.sum(axis=1) as aligned lane-chunk adds (pure VPU).
        h = jnp.dot(w_ref[...], x_ref[...], preferred_element_type=jnp.float32)
        h = jnp.maximum(h + b_ref[...], 0.0)            # (e_set, n_seg*b_tile)
        s = h[:, 0:b_tile]
        for j in range(1, n_seg):
            s = s + h[:, j * b_tile:(j + 1) * b_tile]   # (e_set, b_tile)
        return s

    si = enc_sum(xi_ref, wi_ref, bi_ref, s_i)           # instance set
    sv = enc_sum(xv_ref, wv_ref, bv_ref, s_v)           # context set
    sp = enc_sum(xp_ref, wp_ref, bp_ref, s_p)           # parent set

    hn = jnp.dot(wn_ref[...], xn_ref[...], preferred_element_type=jnp.float32)
    hn = jnp.maximum(hn + bn_ref[...], 0.0)             # node encoder (e_ne, b_tile)

    # Sublane-aligned stack of encoder outputs, then the fused block-diagonal
    # aggregator matmul; the identity block passes the node embedding through
    # (ReLU is idempotent on the already-ReLU'd hn).
    s1 = jnp.concatenate([si, sv, sp, hn], axis=0)      # (e1, b_tile)
    emb = jnp.dot(w2_ref[...], s1, preferred_element_type=jnp.float32)
    emb = jnp.maximum(emb + b2_ref[...], 0.0)           # (e2, b_tile)

    # Predictor Linear(e2 -> 1) + Sigmoid as a lane-dense (1, b_tile) row.
    logit = jnp.dot(w3_ref[...], emb, preferred_element_type=jnp.float32)
    out_ref[...] = jax.nn.sigmoid(logit + b3_ref[...])


# ------------------------------ JAX wrapper -------------------------------- #
def pareto_state_predictor(params, instf, vf, nf, pf, *, b_tile=None):
    ie_ew, ie_eb, ie_aw, ie_ab = params["ie"]
    ce_ew, ce_eb, ce_aw, ce_ab = params["ce"]
    pe_ew, pe_eb, pe_aw, pe_ab = params["pe"]
    ne_w, ne_b = params["ne"]
    pr_w, pr_b = params["pr"]

    f32 = jnp.float32
    B = instf.shape[0]
    s_i, d_i = instf.shape[1], instf.shape[2]
    s_v, d_v = vf.shape[1], vf.shape[2]
    s_p, d_p = pf.shape[1], pf.shape[2]
    d_n = nf.shape[1]
    e_ie, e_ce = ie_ew.shape[1], ce_ew.shape[1]
    e_pe, e_ne = pe_ew.shape[1], ne_w.shape[1]
    a_ie, a_ce, a_pe = ie_aw.shape[1], ce_aw.shape[1], pe_aw.shape[1]

    # encoder-output (e1) row offsets in s1 -- kernel stack order (ie, ce, pe, ne)
    o_i, o_v, o_p, o_n = 0, e_ie, e_ie + e_ce, e_ie + e_ce + e_pe
    e1 = o_n + e_ne
    # embedding (e2) row offsets -- torch concat order (ie, ve, ne, pe)
    m_i, m_v, m_n, m_p = 0, a_ie, a_ie + a_ce, a_ie + a_ce + e_ne
    e2 = m_p + a_pe

    # ---- batch tiling: the batch rides the lane axis -> multiples of 128 ----
    b_req = _round_up(B, 128)
    if b_tile is None:
        b_tile = min(1024, b_req)
        # ensure >= 2 grid steps when the batch allows it, so the ("parallel",)
        # axis can split across v7x's two TensorCores
        if b_req // b_tile < 2 and b_req >= 256:
            b_tile = _round_up(b_req // 2, 128)
    b_tile = _round_up(b_tile, 128)
    b_pad = _round_up(B, b_tile)
    n_tiles = b_pad // b_tile

    # ---- lane-dense transposed inputs: (d, n_tiles * S * b_tile) ----
    # One pad+transpose copy per input (fuses into a single XLA producer each);
    # no zero-filled block-diagonal slab is ever materialized in HBM.
    def to_lanes(x):
        x = x.astype(f32)
        s, d = x.shape[1], x.shape[2]
        x = jnp.pad(x, ((0, b_pad - B), (0, 0), (0, 0)))
        x = x.reshape(n_tiles, b_tile, s, d).transpose(3, 0, 2, 1)
        return x.reshape(d, n_tiles * s * b_tile)

    xi = to_lanes(instf)
    xv = to_lanes(vf)
    xp = to_lanes(pf)
    xn = to_lanes(nf[:, None, :])

    # ---- weights, pre-transposed for the batch-on-lanes layout ----
    wi, bi = ie_ew.T.astype(f32), ie_eb.reshape(-1, 1).astype(f32)
    wv, bv = ce_ew.T.astype(f32), ce_eb.reshape(-1, 1).astype(f32)
    wp, bp = pe_ew.T.astype(f32), pe_eb.reshape(-1, 1).astype(f32)
    wn, bn = ne_w.T.astype(f32), ne_b.reshape(-1, 1).astype(f32)

    # fused block-diagonal aggregator (+ identity pass-through for the node path)
    w2 = jnp.zeros((e2, e1), f32)
    w2 = w2.at[m_i:m_i + a_ie, o_i:o_i + e_ie].set(ie_aw.T.astype(f32))
    w2 = w2.at[m_v:m_v + a_ce, o_v:o_v + e_ce].set(ce_aw.T.astype(f32))
    w2 = w2.at[m_p:m_p + a_pe, o_p:o_p + e_pe].set(pe_aw.T.astype(f32))
    w2 = w2.at[m_n:m_n + e_ne, o_n:o_n + e_ne].set(jnp.eye(e_ne, dtype=f32))
    b2 = jnp.zeros((e2, 1), f32)
    b2 = b2.at[m_i:m_i + a_ie, 0].set(ie_ab.reshape(-1).astype(f32))
    b2 = b2.at[m_v:m_v + a_ce, 0].set(ce_ab.reshape(-1).astype(f32))
    b2 = b2.at[m_p:m_p + a_pe, 0].set(pe_ab.reshape(-1).astype(f32))

    w3 = pr_w.reshape(-1)[None, :].astype(f32)   # (1, e2)
    b3 = pr_b.reshape(1, 1).astype(f32)

    # TODO(synk): on v6e/v7x, cast the x*/w* MXU operands to bf16 (keep f32
    # accumulation via preferred_element_type) to halve the dominant HBM read;
    # kept f32 here so the 1e-5 f32 reference check stays exact.

    wspec = lambda shape: pl.BlockSpec(shape, lambda i: (0, 0))

    out = pl.pallas_call(
        functools.partial(_pareto_kernel, s_i=s_i, s_v=s_v, s_p=s_p,
                          b_tile=b_tile),
        out_shape=jax.ShapeDtypeStruct((1, b_pad), f32),
        grid=(n_tiles,),
        in_specs=[
            pl.BlockSpec((d_i, s_i * b_tile), lambda i: (0, i)),   # instance set
            pl.BlockSpec((d_v, s_v * b_tile), lambda i: (0, i)),   # context set
            pl.BlockSpec((d_p, s_p * b_tile), lambda i: (0, i)),   # parent set
            pl.BlockSpec((d_n, b_tile), lambda i: (0, i)),         # node feats
            wspec((e_ie, d_i)), wspec((e_ie, 1)),
            wspec((e_ce, d_v)), wspec((e_ce, 1)),
            wspec((e_pe, d_p)), wspec((e_pe, 1)),
            wspec((e_ne, d_n)), wspec((e_ne, 1)),
            wspec((e2, e1)), wspec((e2, 1)),
            wspec((1, e2)), wspec((1, 1)),
        ],
        out_specs=pl.BlockSpec((1, b_tile), lambda i: (0, i)),
        compiler_params=pltpu.CompilerParams(
            dimension_semantics=("parallel",)),
    )(xi, xv, xp, xn, wi, bi, wv, bv, wp, bp, wn, bn, w2, b2, w3, b3)

    # padded lanes (B..b_pad) hold garbage from zero-padded rows -> keep slice.
    return out[0, :B][:, None]


# --------------------------- parameter creation ----------------------------- #
def _init_linear(key, fan_in, fan_out):
    """PyTorch nn.Linear default init: U(-1/sqrt(fan_in), 1/sqrt(fan_in)).
    Weight stored as (in, out) so the reference forward does x @ W + b."""
    k = 1.0 / np.sqrt(fan_in)
    kw, kb = jax.random.split(key)
    w = jax.random.uniform(kw, (fan_in, fan_out), jnp.float32, -k, k)
    b = jax.random.uniform(kb, (1, fan_out), jnp.float32, -k, k)
    return w, b


def init_params(key, cfg):
    keys = jax.random.split(key, 9)
    ie_ew, ie_eb = _init_linear(keys[0], cfg["ie_enc"][0], cfg["ie_enc"][1])
    ie_aw, ie_ab = _init_linear(keys[1], cfg["ie_agg"][0], cfg["ie_agg"][1])
    ce_ew, ce_eb = _init_linear(keys[2], cfg["ce_enc"][0], cfg["ce_enc"][1])
    ce_aw, ce_ab = _init_linear(keys[3], cfg["ce_agg"][0], cfg["ce_agg"][1])
    pe_ew, pe_eb = _init_linear(keys[4], cfg["pe_enc"][0], cfg["pe_enc"][1])
    pe_aw, pe_ab = _init_linear(keys[5], cfg["pe_agg"][0], cfg["pe_agg"][1])
    ne_w, ne_b = _init_linear(keys[6], cfg["ne"][0], cfg["ne"][1])
    pred_in = cfg["ie_agg"][-1] + cfg["ce_agg"][-1] + cfg["pe_agg"][-1] + cfg["ne"][-1]
    pr_w, pr_b = _init_linear(keys[7], pred_in, 1)
    return {
        "ie": (ie_ew, ie_eb, ie_aw, ie_ab),
        "ce": (ce_ew, ce_eb, ce_aw, ce_ab),
        "pe": (pe_ew, pe_eb, pe_aw, pe_ab),
        "ne": (ne_w, ne_b),
        "pr": (pr_w, pr_b),
    }


# ----------------------------- pure-JAX reference --------------------------- #
def ref_forward(params, instf, vf, nf, pf):
    def set_enc(x, ew, eb, aw, ab):
        h = jax.nn.relu(x @ ew + eb)          # (B, S, E)
        s = jnp.sum(h, axis=1)                # (B, E)
        return jax.nn.relu(s @ aw + ab)       # (B, A)

    ie = set_enc(instf, *params["ie"])
    ve = set_enc(vf, *params["ce"])
    pe = set_enc(pf, *params["pe"])
    ne_w, ne_b = params["ne"]
    ne = jax.nn.relu(nf @ ne_w + ne_b)
    emb = jnp.concatenate((ie, ve, ne, pe), axis=1)
    pr_w, pr_b = params["pr"]
    return jax.nn.sigmoid(emb @ pr_w + pr_b)


# ----------------------------------- main ----------------------------------- #
if __name__ == "__main__":
    cfg = {
        "ie_enc": [2, 16], "ie_agg": [16, 32],
        "ce_enc": [3, 16], "ce_agg": [16, 32],
        "pe_enc": [2, 16], "pe_agg": [16, 32],
        "ne": [4, 32],
    }

    key = jax.random.PRNGKey(0)
    kp, k1, k2, k3, k4 = jax.random.split(key, 5)
    params = init_params(kp, cfg)

    B, S_inst, S_var, S_par = 8, 6, 5, 4
    instf = jax.random.normal(k1, (B, S_inst, cfg["ie_enc"][0]), jnp.float32)
    vf = jax.random.normal(k2, (B, S_var, cfg["ce_enc"][0]), jnp.float32)
    pf = jax.random.normal(k3, (B, S_par, cfg["pe_enc"][0]), jnp.float32)
    nf = jax.random.normal(k4, (B, cfg["ne"][0]), jnp.float32)

    fwd = jax.jit(pareto_state_predictor)
    out = jax.block_until_ready(fwd(params, instf, vf, nf, pf))

    expected = jax.block_until_ready(ref_forward(params, instf, vf, nf, pf))
    assert out.shape == (B, 1), out.shape
    np.testing.assert_allclose(np.asarray(out), np.asarray(expected),
                               rtol=1e-5, atol=1e-5)
    print("KERNEL_OK")
</pallas_src>

<mosaic_0001>
module attributes {stable_mosaic.version = 11 : i64} {
  func.func @_pareto_kernel(%arg0: i32, %arg1: memref<2x768xf32, #tpu.memory_space<vmem>>, %arg2: memref<3x640xf32, #tpu.memory_space<vmem>>, %arg3: memref<2x512xf32, #tpu.memory_space<vmem>>, %arg4: memref<4x128xf32, #tpu.memory_space<vmem>>, %arg5: memref<16x2xf32, #tpu.memory_space<vmem>>, %arg6: memref<16x1xf32, #tpu.memory_space<vmem>>, %arg7: memref<16x3xf32, #tpu.memory_space<vmem>>, %arg8: memref<16x1xf32, #tpu.memory_space<vmem>>, %arg9: memref<16x2xf32, #tpu.memory_space<vmem>>, %arg10: memref<16x1xf32, #tpu.memory_space<vmem>>, %arg11: memref<32x4xf32, #tpu.memory_space<vmem>>, %arg12: memref<32x1xf32, #tpu.memory_space<vmem>>, %arg13: memref<128x80xf32, #tpu.memory_space<vmem>>, %arg14: memref<128x1xf32, #tpu.memory_space<vmem>>, %arg15: memref<1x128xf32, #tpu.memory_space<vmem>>, %arg16: memref<1x1xf32, #tpu.memory_space<vmem>>, %arg17: memref<1x128xf32, #tpu.memory_space<vmem>>) attributes {dimension_semantics = [#tpu.dimension_semantics<parallel>], iteration_bounds = array<i64: 1>, scalar_prefetch = 0 : i64, scratch_operands = 0 : i64, tpu.core_type = #tpu.core_type<tc>, window_params = [{transform_indices = @transform_0, window_bounds = array<i64: 2, 768>}, {transform_indices = @transform_1, window_bounds = array<i64: 3, 640>}, {transform_indices = @transform_2, window_bounds = array<i64: 2, 512>}, {transform_indices = @transform_3, window_bounds = array<i64: 4, 128>}, {pipeline_mode = #tpu.pipeline_mode<synchronous>, transform_indices = @transform_4, window_bounds = array<i64: 16, 2>}, {pipeline_mode = #tpu.pipeline_mode<synchronous>, transform_indices = @transform_5, window_bounds = array<i64: 16, 1>}, {pipeline_mode = #tpu.pipeline_mode<synchronous>, transform_indices = @transform_6, window_bounds = array<i64: 16, 3>}, {pipeline_mode = #tpu.pipeline_mode<synchronous>, transform_indices = @transform_7, window_bounds = array<i64: 16, 1>}, {pipeline_mode = #tpu.pipeline_mode<synchronous>, transform_indices = @transform_8, window_bounds = array<i64: 16, 2>}, {pipeline_mode = #tpu.pipeline_mode<synchronous>, transform_indices = @transform_9, window_bounds = array<i64: 16, 1>}, {pipeline_mode = #tpu.pipeline_mode<synchronous>, transform_indices = @transform_10, window_bounds = array<i64: 32, 4>}, {pipeline_mode = #tpu.pipeline_mode<synchronous>, transform_indices = @transform_11, window_bounds = array<i64: 32, 1>}, {pipeline_mode = #tpu.pipeline_mode<synchronous>, transform_indices = @transform_12, window_bounds = array<i64: 128, 80>}, {pipeline_mode = #tpu.pipeline_mode<synchronous>, transform_indices = @transform_13, window_bounds = array<i64: 128, 1>}, {pipeline_mode = #tpu.pipeline_mode<synchronous>, transform_indices = @transform_14, window_bounds = array<i64: 1, 128>}, {pipeline_mode = #tpu.pipeline_mode<synchronous>, transform_indices = @transform_15, window_bounds = array<i64: 1, 1>}, {transform_indices = @transform_16, window_bounds = array<i64: 1, 128>}]} {
    %c0 = arith.constant 0 : index
    %c0_0 = arith.constant 0 : index
    %0 = vector.load %arg5[%c0, %c0_0] : memref<16x2xf32, #tpu.memory_space<vmem>>, vector<16x2xf32>
    %c0_1 = arith.constant 0 : index
    %c0_2 = arith.constant 0 : index
    %1 = vector.load %arg1[%c0_1, %c0_2] : memref<2x768xf32, #tpu.memory_space<vmem>>, vector<2x768xf32>
    %cst = arith.constant dense<0.000000e+00> : vector<16x768xf32>
    %2 = tpu.matmul %0, %1, %cst {dimension_numbers = #tpu.dot_dimension_numbers<[1], [0], [0], [1], [0, 0, 1, 1], [], []>} : vector<16x2xf32>, vector<2x768xf32>, vector<16x768xf32> -> vector<16x768xf32>
    %c0_3 = arith.constant 0 : index
    %c0_4 = arith.constant 0 : index
    %3 = vector.load %arg6[%c0_3, %c0_4] : memref<16x1xf32, #tpu.memory_space<vmem>>, vector<16x1xf32>
    %4 = vector.broadcast %3 : vector<16x1xf32> to vector<16x768xf32>
    %5 = arith.addf %2, %4 : vector<16x768xf32>
    %cst_5 = arith.constant 0.000000e+00 : f32
    %6 = vector.broadcast %cst_5 : f32 to vector<16x768xf32>
    %7 = arith.maximumf %5, %6 : vector<16x768xf32>
    %8 = vector.extract_strided_slice %7 {offsets = [0, 0], sizes = [16, 128], strides = [1, 1]} : vector<16x768xf32> to vector<16x128xf32>
    %9 = vector.extract_strided_slice %7 {offsets = [0, 128], sizes = [16, 128], strides = [1, 1]} : vector<16x768xf32> to vector<16x128xf32>
    %10 = arith.addf %8, %9 : vector<16x128xf32>
    %11 = vector.extract_strided_slice %7 {offsets = [0, 256], sizes = [16, 128], strides = [1, 1]} : vector<16x768xf32> to vector<16x128xf32>
    %12 = arith.addf %10, %11 : vector<16x128xf32>
    %13 = vector.extract_strided_slice %7 {offsets = [0, 384], sizes = [16, 128], strides = [1, 1]} : vector<16x768xf32> to vector<16x128xf32>
    %14 = arith.addf %12, %13 : vector<16x128xf32>
    %15 = vector.extract_strided_slice %7 {offsets = [0, 512], sizes = [16, 128], strides = [1, 1]} : vector<16x768xf32> to vector<16x128xf32>
    %16 = arith.addf %14, %15 : vector<16x128xf32>
    %17 = vector.extract_strided_slice %7 {offsets = [0, 640], sizes = [16, 128], strides = [1, 1]} : vector<16x768xf32> to vector<16x128xf32>
    %18 = arith.addf %16, %17 : vector<16x128xf32>
    %c0_6 = arith.constant 0 : index
    %c0_7 = arith.constant 0 : index
    %19 = vector.load %arg7[%c0_6, %c0_7] : memref<16x3xf32, #tpu.memory_space<vmem>>, vector<16x3xf32>
    %c0_8 = arith.constant 0 : index
    %c0_9 = arith.constant 0 : index
    %20 = vector.load %arg2[%c0_8, %c0_9] : memref<3x640xf32, #tpu.memory_space<vmem>>, vector<3x640xf32>
    %cst_10 = arith.constant dense<0.000000e+00> : vector<16x640xf32>
    %21 = tpu.matmul %19, %20, %cst_10 {dimension_numbers = #tpu.dot_dimension_numbers<[1], [0], [0], [1], [0, 0, 1, 1], [], []>} : vector<16x3xf32>, vector<3x640xf32>, vector<16x640xf32> -> vector<16x640xf32>
    %c0_11 = arith.constant 0 : index
    %c0_12 = arith.constant 0 : index
    %22 = vector.load %arg8[%c0_11, %c0_12] : memref<16x1xf32, #tpu.memory_space<vmem>>, vector<16x1xf32>
    %23 = vector.broadcast %22 : vector<16x1xf32> to vector<16x640xf32>
    %24 = arith.addf %21, %23 : vector<16x640xf32>
    %cst_13 = arith.constant 0.000000e+00 : f32
    %25 = vector.broadcast %cst_13 : f32 to vector<16x640xf32>
    %26 = arith.maximumf %24, %25 : vector<16x640xf32>
    %27 = vector.extract_strided_slice %26 {offsets = [0, 0], sizes = [16, 128], strides = [1, 1]} : vector<16x640xf32> to vector<16x128xf32>
    %28 = vector.extract_strided_slice %26 {offsets = [0, 128], sizes = [16, 128], strides = [1, 1]} : vector<16x640xf32> to vector<16x128xf32>
    %29 = arith.addf %27, %28 : vector<16x128xf32>
    %30 = vector.extract_strided_slice %26 {offsets = [0, 256], sizes = [16, 128], strides = [1, 1]} : vector<16x640xf32> to vector<16x128xf32>
    %31 = arith.addf %29, %30 : vector<16x128xf32>
    %32 = vector.extract_strided_slice %26 {offsets = [0, 384], sizes = [16, 128], strides = [1, 1]} : vector<16x640xf32> to vector<16x128xf32>
    %33 = arith.addf %31, %32 : vector<16x128xf32>
    %34 = vector.extract_strided_slice %26 {offsets = [0, 512], sizes = [16, 128], strides = [1, 1]} : vector<16x640xf32> to vector<16x128xf32>
    %35 = arith.addf %33, %34 : vector<16x128xf32>
    %c0_14 = arith.constant 0 : index
    %c0_15 = arith.constant 0 : index
    %36 = vector.load %arg9[%c0_14, %c0_15] : memref<16x2xf32, #tpu.memory_space<vmem>>, vector<16x2xf32>
    %c0_16 = arith.constant 0 : index
    %c0_17 = arith.constant 0 : index
    %37 = vector.load %arg3[%c0_16, %c0_17] : memref<2x512xf32, #tpu.memory_space<vmem>>, vector<2x512xf32>
    %cst_18 = arith.constant dense<0.000000e+00> : vector<16x512xf32>
    %38 = tpu.matmul %36, %37, %cst_18 {dimension_numbers = #tpu.dot_dimension_numbers<[1], [0], [0], [1], [0, 0, 1, 1], [], []>} : vector<16x2xf32>, vector<2x512xf32>, vector<16x512xf32> -> vector<16x512xf32>
    %c0_19 = arith.constant 0 : index
    %c0_20 = arith.constant 0 : index
    %39 = vector.load %arg10[%c0_19, %c0_20] : memref<16x1xf32, #tpu.memory_space<vmem>>, vector<16x1xf32>
    %40 = vector.broadcast %39 : vector<16x1xf32> to vector<16x512xf32>
    %41 = arith.addf %38, %40 : vector<16x512xf32>
    %cst_21 = arith.constant 0.000000e+00 : f32
    %42 = vector.broadcast %cst_21 : f32 to vector<16x512xf32>
    %43 = arith.maximumf %41, %42 : vector<16x512xf32>
    %44 = vector.extract_strided_slice %43 {offsets = [0, 0], sizes = [16, 128], strides = [1, 1]} : vector<16x512xf32> to vector<16x128xf32>
    %45 = vector.extract_strided_slice %43 {offsets = [0, 128], sizes = [16, 128], strides = [1, 1]} : vector<16x512xf32> to vector<16x128xf32>
    %46 = arith.addf %44, %45 : vector<16x128xf32>
    %47 = vector.extract_strided_slice %43 {offsets = [0, 256], sizes = [16, 128], strides = [1, 1]} : vector<16x512xf32> to vector<16x128xf32>
    %48 = arith.addf %46, %47 : vector<16x128xf32>
    %49 = vector.extract_strided_slice %43 {offsets = [0, 384], sizes = [16, 128], strides = [1, 1]} : vector<16x512xf32> to vector<16x128xf32>
    %50 = arith.addf %48, %49 : vector<16x128xf32>
    %c0_22 = arith.constant 0 : index
    %c0_23 = arith.constant 0 : index
    %51 = vector.load %arg11[%c0_22, %c0_23] : memref<32x4xf32, #tpu.memory_space<vmem>>, vector<32x4xf32>
    %c0_24 = arith.constant 0 : index
    %c0_25 = arith.constant 0 : index
    %52 = vector.load %arg4[%c0_24, %c0_25] : memref<4x128xf32, #tpu.memory_space<vmem>>, vector<4x128xf32>
    %cst_26 = arith.constant dense<0.000000e+00> : vector<32x128xf32>
    %53 = tpu.matmul %51, %52, %cst_26 {dimension_numbers = #tpu.dot_dimension_numbers<[1], [0], [0], [1], [0, 0, 1, 1], [], []>} : vector<32x4xf32>, vector<4x128xf32>, vector<32x128xf32> -> vector<32x128xf32>
    %c0_27 = arith.constant 0 : index
    %c0_28 = arith.constant 0 : index
    %54 = vector.load %arg12[%c0_27, %c0_28] : memref<32x1xf32, #tpu.memory_space<vmem>>, vector<32x1xf32>
    %55 = vector.broadcast %54 : vector<32x1xf32> to vector<32x128xf32>
    %56 = arith.addf %53, %55 : vector<32x128xf32>
    %cst_29 = arith.constant 0.000000e+00 : f32
    %57 = vector.broadcast %cst_29 : f32 to vector<32x128xf32>
    %58 = arith.maximumf %56, %57 : vector<32x128xf32>
    %59 = tpu.concatenate %18, %35, %50, %58 in 0 : vector<16x128xf32>, vector<16x128xf32>, vector<16x128xf32>, vector<32x128xf32> -> vector<80x128xf32>
    %c0_30 = arith.constant 0 : index
    %c0_31 = arith.constant 0 : index
    %60 = vector.load %arg13[%c0_30, %c0_31] : memref<128x80xf32, #tpu.memory_space<vmem>>, vector<128x80xf32>
    %cst_32 = arith.constant dense<0.000000e+00> : vector<128x128xf32>
    %61 = tpu.matmul %60, %59, %cst_32 {dimension_numbers = #tpu.dot_dimension_numbers<[1], [0], [0], [1], [0, 0, 1, 1], [], []>} : vector<128x80xf32>, vector<80x128xf32>, vector<128x128xf32> -> vector<128x128xf32>
    %c0_33 = arith.constant 0 : index
    %c0_34 = arith.constant 0 : index
    %62 = vector.load %arg14[%c0_33, %c0_34] : memref<128x1xf32, #tpu.memory_space<vmem>>, vector<128x1xf32>
    %63 = vector.broadcast %62 : vector<128x1xf32> to vector<128x128xf32>
    %64 = arith.addf %61, %63 : vector<128x128xf32>
    %cst_35 = arith.constant 0.000000e+00 : f32
    %65 = vector.broadcast %cst_35 : f32 to vector<128x128xf32>
    %66 = arith.maximumf %64, %65 : vector<128x128xf32>
    %c0_36 = arith.constant 0 : index
    %c0_37 = arith.constant 0 : index
    %67 = vector.load %arg15[%c0_36, %c0_37] : memref<1x128xf32, #tpu.memory_space<vmem>>, vector<1x128xf32>
    %cst_38 = arith.constant dense<0.000000e+00> : vector<1x128xf32>
    %68 = tpu.matmul %67, %66, %cst_38 {dimension_numbers = #tpu.dot_dimension_numbers<[1], [0], [0], [1], [0, 0, 1, 1], [], []>} : vector<1x128xf32>, vector<128x128xf32>, vector<1x128xf32> -> vector<1x128xf32>
    %c0_39 = arith.constant 0 : index
    %c0_40 = arith.constant 0 : index
    %69 = vector.load %arg16[%c0_39, %c0_40] : memref<1x1xf32, #tpu.memory_space<vmem>>, vector<1x1xf32>
    %70 = vector.broadcast %69 : vector<1x1xf32> to vector<1x128xf32>
    %71 = arith.addf %68, %70 : vector<1x128xf32>
    %72 = arith.negf %71 : vector<1x128xf32>
    %73 = math.exp %72 : vector<1x128xf32>
    %cst_41 = arith.constant 1.000000e+00 : f32
    %74 = vector.broadcast %cst_41 : f32 to vector<1x128xf32>
    %75 = arith.addf %74, %73 : vector<1x128xf32>
    %76 = arith.divf %74, %75 : vector<1x128xf32>
    %c0_42 = arith.constant 0 : index
    %c0_43 = arith.constant 0 : index
    %77 = vector.load %arg17[%c0_42, %c0_43] : memref<1x128xf32, #tpu.memory_space<vmem>>, vector<1x128xf32>
    tpu.vector_store %arg17[%c0_42, %c0_43], %76 {strides = array<i32>} : memref<1x128xf32, #tpu.memory_space<vmem>>, vector<1x128xf32>,
    return
  }
  func.func @transform_0(%arg0: i32) -> (i32, i32) {
    %c0_i32 = arith.constant 0 : i32
    %c0_i32_0 = arith.constant 0 : i32
    return %c0_i32, %arg0 : i32, i32
  }
  func.func @transform_1(%arg0: i32) -> (i32, i32) {
    %c0_i32 = arith.constant 0 : i32
    %c0_i32_0 = arith.constant 0 : i32
    return %c0_i32, %arg0 : i32, i32
  }
  func.func @transform_2(%arg0: i32) -> (i32, i32) {
    %c0_i32 = arith.constant 0 : i32
    %c0_i32_0 = arith.constant 0 : i32
    return %c0_i32, %arg0 : i32, i32
  }
  func.func @transform_3(%arg0: i32) -> (i32, i32) {
    %c0_i32 = arith.constant 0 : i32
    %c0_i32_0 = arith.constant 0 : i32
    return %c0_i32, %arg0 : i32, i32
  }
  func.func @transform_4(%arg0: i32) -> (i32, i32) {
    %c0_i32 = arith.constant 0 : i32
    %c0_i32_0 = arith.constant 0 : i32
    %c0_i32_1 = arith.constant 0 : i32
    return %c0_i32, %c0_i32_0 : i32, i32
  }
  func.func @transform_5(%arg0: i32) -> (i32, i32) {
    %c0_i32 = arith.constant 0 : i32
    %c0_i32_0 = arith.constant 0 : i32
    %c0_i32_1 = arith.constant 0 : i32
    return %c0_i32, %c0_i32_0 : i32, i32
  }
  func.func @transform_6(%arg0: i32) -> (i32, i32) {
    %c0_i32 = arith.constant 0 : i32
    %c0_i32_0 = arith.constant 0 : i32
    %c0_i32_1 = arith.constant 0 : i32
    return %c0_i32, %c0_i32_0 : i32, i32
  }
  func.func @transform_7(%arg0: i32) -> (i32, i32) {
    %c0_i32 = arith.constant 0 : i32
    %c0_i32_0 = arith.constant 0 : i32
    %c0_i32_1 = arith.constant 0 : i32
    return %c0_i32, %c0_i32_0 : i32, i32
  }
  func.func @transform_8(%arg0: i32) -> (i32, i32) {
    %c0_i32 = arith.constant 0 : i32
    %c0_i32_0 = arith.constant 0 : i32
    %c0_i32_1 = arith.constant 0 : i32
    return %c0_i32, %c0_i32_0 : i32, i32
  }
  func.func @transform_9(%arg0: i32) -> (i32, i32) {
    %c0_i32 = arith.constant 0 : i32
    %c0_i32_0 = arith.constant 0 : i32
    %c0_i32_1 = arith.constant 0 : i32
    return %c0_i32, %c0_i32_0 : i32, i32
  }
  func.func @transform_10(%arg0: i32) -> (i32, i32) {
    %c0_i32 = arith.constant 0 : i32
    %c0_i32_0 = arith.constant 0 : i32
    %c0_i32_1 = arith.constant 0 : i32
    return %c0_i32, %c0_i32_0 : i32, i32
  }
  func.func @transform_11(%arg0: i32) -> (i32, i32) {
    %c0_i32 = arith.constant 0 : i32
    %c0_i32_0 = arith.constant 0 : i32
    %c0_i32_1 = arith.constant 0 : i32
    return %c0_i32, %c0_i32_0 : i32, i32
  }
  func.func @transform_12(%arg0: i32) -> (i32, i32) {
    %c0_i32 = arith.constant 0 : i32
    %c0_i32_0 = arith.constant 0 : i32
    %c0_i32_1 = arith.constant 0 : i32
    return %c0_i32, %c0_i32_0 : i32, i32
  }
  func.func @transform_13(%arg0: i32) -> (i32, i32) {
    %c0_i32 = arith.constant 0 : i32
    %c0_i32_0 = arith.constant 0 : i32
    %c0_i32_1 = arith.constant 0 : i32
    return %c0_i32, %c0_i32_0 : i32, i32
  }
  func.func @transform_14(%arg0: i32) -> (i32, i32) {
    %c0_i32 = arith.constant 0 : i32
    %c0_i32_0 = arith.constant 0 : i32
    %c0_i32_1 = arith.constant 0 : i32
    return %c0_i32, %c0_i32_0 : i32, i32
  }
  func.func @transform_15(%arg0: i32) -> (i32, i32) {
    %c0_i32 = arith.constant 0 : i32
    %c0_i32_0 = arith.constant 0 : i32
    %c0_i32_1 = arith.constant 0 : i32
    return %c0_i32, %c0_i32_0 : i32, i32
  }
  func.func @transform_16(%arg0: i32) -> (i32, i32) {
    %c0_i32 = arith.constant 0 : i32
    %c0_i32_0 = arith.constant 0 : i32
    return %c0_i32, %arg0 : i32, i32
  }
}

</mosaic_0001>

<bundles_post_ra>
// kernel: pareto_state_predictor.1
= control target key start
LH: loop header
LB: loop body
LE: loop exit
PB: predicated region body
PF: predicated region fallthrough
CT: control target
= control target key end

     0   :  { %v77_v0 = vlaneseq  ;;  %v1678_v2 = vmov 1983009808   ;;  %vm105_vm0 = vcmask 1041408   ;;  %v1679_v4 = vmov 0.0   ;;  %s2050_s0 = inlined_call_operand.vmem [shape: f32[2,768], index: 0, kind: input, shape index: {}]   ;;  %s2051_s4 = inlined_call_operand.vmem [shape: f32[16,2], index: 4, kind: input, shape index: {}]   ;;  %s2052_s1 = inlined_call_operand.vmem [shape: f32[3,640], index: 1, kind: input, shape index: {}]   ;;  %s2053_s2 = inlined_call_operand.vmem [shape: f32[2,512], index: 2, kind: input, shape index: {}]   ;;  %s2054_s15 = inlined_call_operand.<no memory space> [shape: f32[1,1], index: 15, kind: input, shape index: {}]   ;;  %s2055_s5 = inlined_call_operand.vmem [shape: f32[16,1], index: 5, kind: input, shape index: {}]   ;;  %s2056_s7 = inlined_call_operand.vmem [shape: f32[16,1], index: 7, kind: input, shape index: {}]   ;;  %s2057_s6 = inlined_call_operand.vmem [shape: f32[16,3], index: 6, kind: input, shape index: {}]   ;;  %s2058_s9 = inlined_call_operand.vmem [shape: f32[16,1], index: 9, kind: input, shape index: {}]   ;;  %s2059_s8 = inlined_call_operand.vmem [shape: f32[16,2], index: 8, kind: input, shape index: {}]   ;;  %s2060_s11 = inlined_call_operand.vmem [shape: f32[32,1], index: 11, kind: input, shape index: {}]   ;;  %s2061_s13 = inlined_call_operand.vmem [shape: f32[128,1], index: 13, kind: input, shape index: {}]   ;;  %s2062_s3 = inlined_call_operand.vmem [shape: f32[4,128], index: 3, kind: input, shape index: {}]   ;;  %s2063_s10 = inlined_call_operand.vmem [shape: f32[32,4], index: 10, kind: input, shape index: {}]   ;;  %s2064_s12 = inlined_call_operand.vmem [shape: f32[128,80], index: 12, kind: input, shape index: {}]   ;;  %s2065_s14 = inlined_call_operand.vmem [shape: f32[1,128], index: 14, kind: input, shape index: {}]   ;;  %s2066_s16 = inlined_call_operand.vmem [shape: f32[1,128], index: 16, kind: output, shape index: {}]  }
   0x1   :  { %2068 = sst [smem:[#allocation3_spill]] %s2050_s0  ;;  %v75_v3 = vunpack.c.l.s4 %v1678_v2  ;;  %182 = vmatprep.mubr.f32.mxu1 %v1679_v4  ;;  %336 = vmatprep.mubr.f32.mxu0 %v1679_v4  ;;  %v21_v6 = vstv %s2054_s15  ;;  %v374_v10 = vld [vmem:[%s2052_s1 + $0x8] sm:$0x77]  ;;  %v55_v12 = vld [vmem:[%s2051_s4] sm:$0xff]  ;;  %vm98_vm1 = vcmask 15360   ;;  %vm400_vm2 = vcmask 1042432  }
   0x2   :  { %s2069_s23 = sld [smem:[#allocation3_spill]]  ;;  %v1779_v8 = vshrl.u32 %v77_v0, 7  ;;  %22 = vst [vmem:[#allocation2] sm:$0x1] %v21_v6  ;;  %v392_v13 = vcombine.high %v374_v10, %v374_v10  ;;  %v1790_v14 = vld [vmem:[%s2053_s2] sm:$0xff]  ;;  %v56_v20 = vld [vmem:[%s2051_s4 + $0x8] sm:$0xff] }
   0x3   :  { %v76_v11 = vunpack.c.0.s8 %v75_v3  ;;  %v674_v15 = vcombine.high %v1790_v14, %v1790_v14  ;;  %v59_v17 = vld [vmem:[%s2055_s5] sm:$0xff]  ;;  %v1680_v24 = vmov 0   ;;  %vm393_vm3 = vcmask 23552   ;;  %v60_v30 = vld [vmem:[%s2055_s5 + $0x8] sm:$0xff]  ;;  %v375_v34 = vld [vmem:[%s2052_s1 + $0x10] sm:$0x7] }
   0x4   :  { %v376_v22 = vld [vmem:[%s2056_s7] sm:$0xff]  ;;  %1668 = vset.pattern.permute.xlu0 %v1680_v24  ;;  %1669 = vset.pattern.permute.xlu1 %v1680_v24  ;;  %v377_v31 = vld [vmem:[%s2056_s7 + $0x8] sm:$0xff]  ;;  %v880_v41 = vld [vmem:[%s2060_s11 + $0x10] sm:$0xff]  ;;  %vm915_vm4 = vcmask 1043456   ;;  %vm902_vm5 = vcmask 31744   ;;  %vm1120_vm6 = vcmask 654336  }
   0x5   :  { %v79_v16 = vsub.s32 %v76_v11, %v1779_v8  ;;  %v373_v23 = vld [vmem:[%s2052_s1] sm:$0x77]  ;;  %63 = vperm.xlu0 %1668, %v59_v17   ;;  %380 = vperm.xlu1 %1669, %v376_v22   ;;  %v372_v32 = vld [vmem:[%s2057_s6 + $0x8] sm:$0xff]  ;;  %v881_v43 = vld [vmem:[%s2060_s11 + $0x18] sm:$0xff]  ;;  %vm1682_vm7 = vmmov 0  }
   0x6   :  { %v391_v28 = vcombine.high %v373_v23, %v373_v23  ;;  %v371_v29 = vld [vmem:[%s2057_s6] sm:$0xff]  ;;  %v662_v36 = vld [vmem:[%s2058_s9 + $0x8] sm:$0xff]  ;;  %v1026_v46 = vld [vmem:[%s2061_s13 + $0x10] sm:$0xff] }
   0x7   :  { %v688_v21 = vrot.slane %v674_v15, %v79_v16  ;;  %v661_v33 = vld [vmem:[%s2058_s9] sm:$0xff]  ;;  %v681_v38 = vrot.slane %v1790_v14, %v79_v16  ;;  %v659_v39 = vld [vmem:[%s2059_s8 + $0x8] sm:$0xff]  ;;  %v1027_v48 = vld [vmem:[%s2061_s13 + $0x18] sm:$0xff] }
   0x8   :  { %v57_v1 = vld [vmem:[%s2069_s23] sm:$0xff]  ;;  %v1422_v5 = vld.sshfl [vmem:[%s2069_s23 + $0x8] sm:$0x33 pattern:$0x76325410]  ;;  %v1030_v51 = vld [vmem:[%s2061_s13 + $0x30] sm:$0xff] }
   0x9   :  { %v73_v7 = vcombine.high %v57_v1, %v57_v1  ;;  %v97_v9 = vcombine.high %v1422_v5, %v1422_v5  ;;  %v80_v18 = vrot.slane %v57_v1, %v79_v16  ;;  %v690_v27 = vcombine.high %v688_v21, %v688_v21  ;;  %68 = vperm.xlu0 %1668, %v60_v30   ;;  %v658_v35 = vld [vmem:[%s2059_s8] sm:$0xff]  ;;  %v879_v40 = vld [vmem:[%s2060_s11 + $0x8] sm:$0xff]  ;;  %v1031_v53 = vld [vmem:[%s2061_s13 + $0x38] sm:$0xff] }
   0xa   :  { %385 = vperm.xlu1 %1669, %v377_v31   ;;  %v878_v37 = vld [vmem:[%s2060_s11] sm:$0xff]  ;;  %v689_v42 = vcombine.high %v681_v38, %v681_v38  ;;  %v1025_v45 = vld [vmem:[%s2061_s13 + $0x8] sm:$0xff]  ;;  %v875_v56 = vld [vmem:[%s2063_s10 + $0x10] sm:$0xff] }
   0xb   :  { %1431 = vmatprep.subr.msk.mxu0 %vm105_vm0, %v97_v9  ;;  %v87_v19 = vrot.slane %v73_v7, %v79_v16  ;;  %v88_v25 = vcombine.high %v80_v18, %v80_v18  ;;  %v1024_v44 = vld [vmem:[%s2061_s13] sm:$0xff]  ;;  %v1029_v50 = vld [vmem:[%s2061_s13 + $0x28] sm:$0xff]  ;;  %v876_v58 = vld [vmem:[%s2063_s10 + $0x18] sm:$0xff] }
   0xc   :  { %1432 = vmatpush1.msk.msra.mxu0 %vm105_vm0, %v1422_v5  ;;  %v877_v47 = vld [vmem:[%s2062_s3] sm:$0xf]  ;;  %v874_v54 = vld [vmem:[%s2063_s10 + $0x8] sm:$0xff]  ;;  %v1034_v59 = vld [vmem:[%s2061_s13 + $0x50] sm:$0xff] }
   0xd   :  { %1433 = vmatmul.mubr.msk.f32.vlgmr.msra.gmra.mrb[0].mxu0 %vm98_vm1, %v55_v12  ;;  %1439 = vmatprep.subr.msk.mxu0 %vm400_vm2, %v392_v13  ;;  %v89_v26 = vcombine.high %v87_v19, %v87_v19  ;;  %v1028_v49 = vld [vmem:[%s2061_s13 + $0x20] sm:$0xff]  ;;  %v1033_v57 = vld [vmem:[%s2061_s13 + $0x48] sm:$0xff]  ;;  %v1035_v60 = vld [vmem:[%s2061_s13 + $0x58] sm:$0xff] }
   0xe   :  { %342 = vmatprep.mubr.f32.mxu0 %v1679_v4  ;;  %1440 = vmatpush1.msk.msra.mxu0 %vm400_vm2, %v374_v10  ;;  %v873_v52 = vld [vmem:[%s2063_s10] sm:$0xff]  ;;  %v1037_v62 = vld [vmem:[%s2061_s13 + $0x68] sm:$0xff]  ;;  %v1038_v63 = vld [vmem:[%s2061_s13 + $0x70] sm:$0xff] }
   0xf   :  { %1423 = vmatprep.subr.msk.mxu1 %vm105_vm0, %v88_v25  ;;  %1450 = vmatprep.subr.msk.mxu0 %vm105_vm0, %v690_v27  ;;  %v1032_v55 = vld [vmem:[%s2061_s13 + $0x40] sm:$0xff]  ;;  %v1039_v0 = vld [vmem:[%s2061_s13 + $0x78] sm:$0xff] }
  0x10   :  { %1424 = vmatpush1.msk.msra.mxu1 %vm105_vm0, %v80_v18  ;;  %665 = vperm.xlu0 %1668, %v661_v33   ;;  %v1036_v61 = vld [vmem:[%s2061_s13 + $0x60] sm:$0xff] }
  0x11   :  { %1434 = vmatmul.mubr.msk.f32.gmra.mrb[2].mxu0 %vm98_vm1, %v56_v20  ;;  %1425 = vmatmul.mubr.msk.f32.vlgmr.msra.gmra.mrb[0].mxu1 %vm98_vm1, %v55_v12  ;;  %v1331_v1 = vld [vmem:[#allocation2] sm:$0x1] }
  0x12   :  { %552 = vmatprep.mubr.f32.mxu0 %v1679_v4  ;;  %1427 = vmatprep.subr.msk.mxu1 %vm105_vm0, %v89_v26  ;;  %v1008_v2 = vld [vmem:[%s2064_s12] sm:$0xff] }
  0x13   :  { %1428 = vmatpush1.msk.msra.mxu1 %vm105_vm0, %v87_v19  ;;  %188 = vmatprep.mubr.f32.mxu1 %v1679_v4 }
  0x14   :  { %1435 = vmatprep.subr.msk.mxu1 %vm400_vm2, %v391_v28  ;;  %670 = vperm.xlu1 %1669, %v662_v36  }
  0x15   :  { %1441 = vmatmul.mubr.msk.f32.vlgmr.msra.gmra.mrb[4].mxu0 %vm393_vm3, %v371_v29  ;;  %1426 = vmatmul.mubr.msk.f32.gmra.mrb[2].mxu1 %vm98_vm1, %v56_v20 }
  0x16   :  { %558 = vmatprep.mubr.f32.mxu0 %v1679_v4  ;;  %1451 = vmatpush1.msk.msra.mxu0 %vm105_vm0, %v688_v21 }
  0x17   :  { %259 = vmatprep.mubr.f32.mxu1 %v1679_v4  ;;  %884 = vperm.xlu0 %1668, %v878_v37  }
  0x18   :  { %889 = vperm.xlu1 %1669, %v879_v40  }
  0x19   :  { %1442 = vmatmul.mubr.msk.f32.gmra.mrb[6].mxu0 %vm393_vm3, %v372_v32  ;;  %1429 = vmatmul.mubr.msk.f32.vlgmr.msra.gmra.mrb[4].mxu1 %vm98_vm1, %v55_v12 }
  0x1a   :  { %846 = vmatprep.mubr.f32.mxu0 %v1679_v4  ;;  %1436 = vmatpush1.msk.msra.mxu1 %vm400_vm2, %v373_v23 }
  0x1b   :  { %265 = vmatprep.mubr.f32.mxu1 %v1679_v4  ;;  %1527 = vmatprep.subr.msk.mxu1 %vm400_vm2, %v375_v34 }
  0x1c   :  { %894 = vperm.xlu0 %1668, %v880_v41   ;;  %899 = vperm.xlu1 %1669, %v881_v43  }
  0x1d   :  { %1452 = vmatmul.mubr.msk.f32.vlgmr.msra.gmra.mrb[8].mxu0 %vm98_vm1, %v658_v35  ;;  %1430 = vmatmul.mubr.msk.f32.gmra.mrb[6].mxu1 %vm98_vm1, %v56_v20 }
  0x1e   :  { %852 = vmatprep.mubr.f32.mxu0 %v1679_v4  ;;  %475 = vmatprep.mubr.f32.mxu1 %v1679_v4 }
  0x20   :  { %1042 = vperm.xlu0 %1668, %v1024_v44   ;;  %1047 = vperm.xlu1 %1669, %v1025_v45  }
  0x21   :  { %1453 = vmatmul.mubr.msk.f32.gmra.mrb[10].mxu0 %vm98_vm1, %v659_v39  ;;  %1437 = vmatmul.mubr.msk.f32.vlgmr.msra.gmra.mrb[8].mxu1 %vm393_vm3, %v371_v29 }
  0x22   :  { %1528 = vmatpush3.msk.msra.mxu1 %vm400_vm2, %v375_v34  ;;  %481 = vmatprep.mubr.f32.mxu1 %v1679_v4 }
  0x23   :  { %1446 = vmatprep.subr.msk.mxu1 %vm105_vm0, %v689_v42  ;;  %1560 = vmatprep.mubr.msk.f32.mxu0 %vm1120_vm6, %v1008_v2 }
  0x24   :  { %1052 = vperm.xlu0 %1668, %v1026_v46   ;;  %1057 = vperm.xlu1 %1669, %v1027_v48  }
  0x25   :  { %1438 = vmatmul.mubr.msk.f32.gmra.mrb[10].mxu1 %vm393_vm3, %v372_v32 }
  0x26   :  { %1529 = vmatprep.mubr.msk.f32.mxu1 %vm393_vm3, %v371_v29 }
  0x28   :  { %1062 = vperm.xlu0 %1668, %v1028_v49   ;;  %1067 = vperm.xlu1 %1669, %v1029_v50  }
  0x29   :  { %1530 = vmatmul.mubr.msk.f32.vlgmr.msra.gmra.mrb[12].mxu1 %vm393_vm3, %v372_v32 }
  0x2a   :  { %1447 = vmatpush1.msk.msra.mxu1 %vm105_vm0, %v681_v38  ;;  %769 = vmatprep.mubr.f32.mxu1 %v1679_v4 }
  0x2b   :  { %1532 = vmatprep.subr.msk.mxu1 %vm915_vm4, %v877_v47 }
  0x2c   :  { %1072 = vperm.xlu0 %1668, %v1030_v51   ;;  %1077 = vperm.xlu1 %1669, %v1031_v53  }
  0x2d   :  { %1448 = vmatmul.mubr.msk.f32.vlgmr.msra.gmra.mrb[14].mxu1 %vm98_vm1, %v658_v35 }
  0x2e   :  { %775 = vmatprep.mubr.f32.mxu1 %v1679_v4  ;;  %1533 = vmatpush3.msk.msra.mxu1 %vm915_vm4, %v877_v47 }
  0x30   :  { %1082 = vperm.xlu0 %1668, %v1032_v55   ;;  %1087 = vperm.xlu1 %1669, %v1033_v57  }
  0x31   :  { %1449 = vmatmul.mubr.msk.f32.gmra.mrb[16].mxu1 %vm98_vm1, %v659_v39 }
  0x32   :  { %1534 = vmatprep.mubr.msk.f32.mxu1 %vm902_vm5, %v873_v52 }
  0x34   :  { %1092 = vperm.xlu0 %1668, %v1034_v59   ;;  %1097 = vperm.xlu1 %1669, %v1035_v60  }
  0x35   :  { %1535 = vmatmul.mubr.msk.f32.vlgmr.msra.gmra.mrb[18].mxu1 %vm902_vm5, %v874_v54 }
  0x36   :  { %1537 = vmatprep.mubr.msk.f32.mxu1 %vm902_vm5, %v875_v56 }
  0x38   :  { %1102 = vperm.xlu0 %1668, %v1036_v61   ;;  %1107 = vperm.xlu1 %1669, %v1037_v62  }
  0x39   :  { %1538 = vmatmul.mubr.msk.f32.gmra.mrb[20].mxu1 %vm902_vm5, %v876_v58 }
  0x3a   :  { %1616 = vmatprep.mubr.msk.f32.mxu1 %vm1682_vm7, %v1679_v4 }
  0x3c   :  { %1112 = vperm.xlu0 %1668, %v1038_v63   ;;  %1117 = vperm.xlu1 %1669, %v1039_v0  }
  0x40   :  { %1334 = vperm.xlu0 %1668, %v1331_v1  }
  0x84   :  { %v64_v7 = vpop.permute.xlu0 %63  ;;  %v381_v40 = vpop.permute.xlu1 %380 }
  0x88   :  { %v69_v17 = vpop.permute.xlu0 %68 }
  0x89   :  { %v386_v63 = vpop.permute.xlu1 %385 }
  0xe0   :  { %v338_v3 = vpop.f32.mrb[0].mxu0 }
  0xe1   :  { %v340_v5 = vpop.f32.mrb[1].mxu0  ;;  %v339_v31 = vadd.f32 %v338_v3, %v64_v7 }
  0xe2   :  { %v341_v36 = vadd.f32 %v340_v5, %v64_v7 }
  0xe3   :  { %v353_v42 = vmax.f32 %v339_v31, 0.0  ;;  %v671_v31 = vpop.permute.xlu1 %670 }
  0xe4   :  { %v344_v6 = vpop.f32.mrb[2].mxu0  ;;  %v184_v10 = vpop.f32.mrb[0].mxu1  ;;  %v354_v49 = vmax.f32 %v341_v36, 0.0 }
  0xe5   :  { %v346_v9 = vpop.f32.mrb[3].mxu0  ;;  %v185_v11 = vadd.f32 %v184_v10, %v64_v7  ;;  %v186_v12 = vpop.f32.mrb[1].mxu1  ;;  %v345_v43 = vadd.f32 %v344_v6, %v69_v17 }
  0xe6   :  { %v187_v13 = vadd.f32 %v186_v12, %v64_v7  ;;  %v347_v51 = vadd.f32 %v346_v9, %v69_v17 }
  0xe7   :  { %v349_v15 = vmax.f32 %v185_v11, 0.0  ;;  %v359_v57 = vmax.f32 %v345_v43, 0.0 }
  0xe8   :  { %v554_v14 = vpop.f32.mrb[4].mxu0  ;;  %v350_v18 = vmax.f32 %v187_v13, 0.0  ;;  %v190_v19 = vpop.f32.mrb[2].mxu1  ;;  %v360_v1 = vmax.f32 %v347_v51, 0.0 }
  0xe9   :  { %v556_v16 = vpop.f32.mrb[5].mxu0  ;;  %v191_v20 = vadd.f32 %v190_v19, %v69_v17  ;;  %v192_v21 = vpop.f32.mrb[3].mxu1  ;;  %v555_v54 = vadd.f32 %v554_v14, %v381_v40 }
  0xea   :  { %v361_v22 = vadd.f32 %v350_v18, %v349_v15  ;;  %v193_v23 = vadd.f32 %v192_v21, %v69_v17  ;;  %v557_v61 = vadd.f32 %v556_v16, %v381_v40 }
  0xeb   :  { %v355_v25 = vmax.f32 %v191_v20, 0.0  ;;  %v642_v5 = vmax.f32 %v555_v54, 0.0  ;;  %v890_v54 = vpop.permute.xlu1 %889 }
  0xec   :  { %v560_v24 = vpop.f32.mrb[6].mxu0  ;;  %v356_v27 = vmax.f32 %v193_v23, 0.0  ;;  %v261_v28 = vpop.f32.mrb[4].mxu1  ;;  %v643_v13 = vmax.f32 %v557_v61, 0.0 }
  0xed   :  { %v562_v26 = vpop.f32.mrb[7].mxu0  ;;  %v262_v29 = vadd.f32 %v261_v28, %v64_v7  ;;  %v263_v30 = vpop.f32.mrb[5].mxu1  ;;  %v561_v6 = vadd.f32 %v560_v24, %v386_v63 }
  0xee   :  { %v362_v32 = vadd.f32 %v356_v27, %v355_v25  ;;  %v264_v33 = vadd.f32 %v263_v30, %v64_v7  ;;  %v563_v16 = vadd.f32 %v562_v26, %v386_v63  ;;  %v666_v30 = vpop.permute.xlu0 %665 }
  0xef   :  { %v351_v35 = vmax.f32 %v262_v29, 0.0  ;;  %v647_v19 = vmax.f32 %v561_v6, 0.0 }
  0xf0   :  { %v1962_v34 = vpop.f32.mrb[8].mxu0  ;;  %v352_v38 = vmax.f32 %v264_v33, 0.0  ;;  %v267_v39 = vpop.f32.mrb[6].mxu1 }
  0xf1   :  { %v1964_v37 = vpop.f32.mrb[9].mxu0  ;;  %v363_v41 = vadd.f32 %v361_v22, %v351_v35  ;;  %v268_v44 = vadd.f32 %v267_v39, %v69_v17  ;;  %v269_v45 = vpop.f32.mrb[7].mxu1 }
  0xf2   :  { %v270_v46 = vadd.f32 %v269_v45, %v69_v17 }
  0xf3   :  { %v365_v48 = vadd.f32 %v363_v41, %v352_v38  ;;  %v357_v50 = vmax.f32 %v268_v44, 0.0  ;;  %v849_v38 = vadd.f32 %v1962_v34, %v666_v30 }
  0xf4   :  { %v1966_v47 = vpop.f32.mrb[10].mxu0  ;;  %v358_v53 = vmax.f32 %v270_v46, 0.0  ;;  %v477_v55 = vpop.f32.mrb[8].mxu1 }
  0xf5   :  { %v1968_v52 = vpop.f32.mrb[11].mxu0  ;;  %v367_v56 = vadd.f32 %v365_v48, %v353_v42  ;;  %v364_v58 = vadd.f32 %v362_v32, %v357_v50  ;;  %v478_v59 = vadd.f32 %v477_v55, %v381_v40  ;;  %v479_v60 = vpop.f32.mrb[9].mxu1  ;;  %v648_v32 = vmax.f32 %v563_v16, 0.0 }
  0xf6   :  { %v480_v62 = vadd.f32 %v479_v60, %v381_v40  ;;  %v861_v50 = vmax.f32 %v849_v38, 0.0  ;;  %v855_v55 = vadd.f32 %v1966_v47, %v671_v31  ;;  %v857_v61 = vadd.f32 %v1968_v52, %v671_v31  ;;  %v1022_v38 = vld [vmem:[%s2064_s12 + $0x70] sm:$0xff] }
  0xf7   :  { %v369_v0 = vadd.f32 %v367_v56, %v354_v49  ;;  %v366_v2 = vadd.f32 %v364_v58, %v358_v53  ;;  %v640_v3 = vmax.f32 %v478_v59, 0.0  ;;  %v885_v58 = vpop.permute.xlu0 %884 }
  0xf8   :  { %v641_v7 = vmax.f32 %v480_v62, 0.0  ;;  %v483_v9 = vpop.f32.mrb[10].mxu1 }
  0xf9   :  { %v368_v10 = vadd.f32 %v366_v2, %v359_v57  ;;  %v484_v11 = vadd.f32 %v483_v9, %v386_v63  ;;  %v485_v12 = vpop.f32.mrb[11].mxu1  ;;  %v865_v2 = vmax.f32 %v855_v55, 0.0  ;;  %v866_v9 = vmax.f32 %v857_v61, 0.0 }
  0xfa   :  { %v650_v14 = vadd.f32 %v641_v7, %v640_v3  ;;  %v486_v15 = vadd.f32 %v485_v12, %v386_v63  ;;  %v900_v7 = vpop.permute.xlu1 %899 }
  0xfb   :  { %v645_v17 = vmax.f32 %v484_v11, 0.0  ;;  %v370_v18 = vadd.f32 %v368_v10, %v360_v1 }
  0xfc   :  { %v652_v20 = vadd.f32 %v650_v14, %v642_v5  ;;  %v646_v21 = vmax.f32 %v486_v15, 0.0  ;;  %v1531_v22 = vpop.f32.mrb[12].mxu1 }
  0xfd   :  { %v631_v23 = vpop.f32.mrb[13].mxu1  ;;  %v1619_v25 = vpack.c.bf16 %v370_v18, %v369_v0  ;;  %v637_v28 = vadd.f32 %v1531_v22, %v386_v63  ;;  %v1009_v22 = vld [vmem:[%s2064_s12 + $0x8] sm:$0xff] }
  0xfe   :  { %v651_v27 = vadd.f32 %v646_v21, %v645_v17  ;;  %v632_v24 = vadd.f32 %v631_v23, %v381_v40  ;;  %v654_v29 = vadd.f32 %v652_v20, %v643_v13  ;;  %v851_v40 = vadd.f32 %v1964_v37, %v666_v30  ;;  %v895_v13 = vpop.permute.xlu0 %894  ;;  %v1010_v23 = vld [vmem:[%s2064_s12 + $0x10] sm:$0xff] }
  0xff   :  { %1620 = vmatprep.subr.bf16.mxu0 %v1619_v25  ;;  %v649_v41 = vmax.f32 %v637_v28, 0.0  ;;  %v1013_v28 = vld [vmem:[%s2064_s12 + $0x28] sm:$0xff] }
 0x100   :  { %v653_v33 = vadd.f32 %v651_v27, %v647_v19  ;;  %v644_v35 = vmax.f32 %v632_v24, 0.0  ;;  %v771_v36 = vpop.f32.mrb[14].mxu1  ;;  %1622 = vmatpush3.bf16.msra.mxu0 %v1619_v25  ;;  %v862_v60 = vmax.f32 %v851_v40, 0.0  ;;  %v1011_v25 = vld [vmem:[%s2064_s12 + $0x18] sm:$0xff]  ;;  %v1012_v27 = vld [vmem:[%s2064_s12 + $0x20] sm:$0xff]  ;;  %v1014_v24 = vld [vmem:[%s2064_s12 + $0x30] sm:$0xff] }
 0x101   :  { %v772_v26 = vadd.f32 %v771_v36, %v666_v30  ;;  %v773_v39 = vpop.f32.mrb[15].mxu1  ;;  %v1021_v36 = vld [vmem:[%s2064_s12 + $0x68] sm:$0xff] }
 0x102   :  { %v655_v42 = vadd.f32 %v653_v33, %v648_v32  ;;  %v656_v43 = vadd.f32 %v654_v29, %v644_v35  ;;  %v774_v44 = vadd.f32 %v773_v39, %v666_v30  ;;  %v1015_v29 = vld [vmem:[%s2064_s12 + $0x38] sm:$0xff]  ;;  %v1016_v30 = vld [vmem:[%s2064_s12 + $0x40] sm:$0xff]  ;;  %v1018_v32 = vld [vmem:[%s2064_s12 + $0x50] sm:$0xff]  ;;  %v1681_v39 = vmov 0.0|0.0  }
 0x103   :  { %v859_v45 = vmax.f32 %v772_v26, 0.0  ;;  %v1019_v33 = vld [vmem:[%s2064_s12 + $0x58] sm:$0xff]  ;;  %v1020_v35 = vld [vmem:[%s2064_s12 + $0x60] sm:$0xff]  ;;  %1639 = vmatprep.subr.bf16.mxu1 %v1681_v39 }
 0x104   :  { %v657_v46 = vadd.f32 %v655_v42, %v649_v41  ;;  %v860_v48 = vmax.f32 %v774_v44, 0.0  ;;  %v777_v49 = vpop.f32.mrb[16].mxu1  ;;  %v1023_v26 = vld [vmem:[%s2064_s12 + $0x78] sm:$0xff]  ;;  %v1048_v41 = vpop.permute.xlu1 %1047 }
 0x105   :  { %v778_v51 = vadd.f32 %v777_v49, %v671_v31  ;;  %v779_v53 = vpop.f32.mrb[17].mxu1  ;;  %v1043_v42 = vpop.permute.xlu0 %1042 }
 0x106   :  { %v867_v56 = vadd.f32 %v860_v48, %v859_v45  ;;  %v780_v34 = vadd.f32 %v779_v53, %v671_v31  ;;  %v1623_v57 = vpack.c.bf16 %v657_v46, %v656_v43  ;;  %v1017_v31 = vld [vmem:[%s2064_s12 + $0x48] sm:$0xff] }
 0x107   :  { %v863_v59 = vmax.f32 %v778_v51, 0.0 }
 0x108   :  { %v869_v62 = vadd.f32 %v867_v56, %v861_v50  ;;  %v864_v63 = vmax.f32 %v780_v34, 0.0  ;;  %v1536_v37 = vpop.f32.mrb[18].mxu1  ;;  %1624 = vmatprep.subr.bf16.mxu0 %v1623_v57  ;;  %v1058_v43 = vpop.permute.xlu1 %1057 }
 0x109   :  { %v991_v0 = vadd.f32 %v1536_v37, %v890_v54  ;;  %v985_v1 = vpop.f32.mrb[19].mxu1  ;;  %1626 = vmatpush3.bf16.msra.mxu0 %v1623_v57  ;;  %v1053_v44 = vpop.permute.xlu0 %1052 }
 0x10a   :  { %v868_v3 = vadd.f32 %v864_v63, %v863_v59  ;;  %v986_v5 = vadd.f32 %v985_v1, %v885_v58  ;;  %v871_v6 = vadd.f32 %v869_v62, %v862_v60 }
 0x10b   :  { %v1005_v47 = vmax.f32 %v991_v0, 0.0 }
 0x10c   :  { %v870_v10 = vadd.f32 %v868_v3, %v865_v2  ;;  %v1004_v11 = vmax.f32 %v986_v5, 0.0  ;;  %v1539_v12 = vpop.f32.mrb[20].mxu1  ;;  %v1068_v45 = vpop.permute.xlu1 %1067 }
 0x10d   :  { %v1001_v14 = vadd.f32 %v1539_v12, %v900_v7  ;;  %v995_v52 = vpop.f32.mrb[21].mxu1  ;;  %v1063_v40 = vpop.permute.xlu0 %1062 }
 0x10e   :  { %v1631_v15 = vpack.c.bf16 %v1005_v47, %v1004_v11  ;;  %v996_v17 = vadd.f32 %v995_v52, %v895_v13  ;;  %v872_v18 = vadd.f32 %v870_v10, %v866_v9 }
 0x10f   :  { %v1007_v19 = vmax.f32 %v1001_v14, 0.0 }
 0x110   :  { %v1006_v16 = vmax.f32 %v996_v17, 0.0  ;;  %v1627_v20 = vpack.c.bf16 %v872_v18, %v871_v6  ;;  %v1078_v53 = vpop.permute.xlu1 %1077 }
 0x111   :  { %v1073_v56 = vpop.permute.xlu0 %1072 }
 0x112   :  { %v1635_v21 = vpack.c.bf16 %v1007_v19, %v1006_v16  ;;  %1628 = vmatprep.subr.bf16.mxu0 %v1627_v20 }
 0x113   :  { %1630 = vmatpush3.bf16.msra.mxu0 %v1627_v20 }
 0x114   :  { %1632 = vmatprep.subr.bf16.mxu0 %v1631_v15  ;;  %v1088_v37 = vpop.permute.xlu1 %1087 }
 0x115   :  { %v1083_v2 = vpop.permute.xlu0 %1082 }
 0x117   :  { %1634 = vmatpush3.bf16.msra.mxu0 %v1631_v15 }
 0x118   :  { %1636 = vmatprep.subr.bf16.mxu0 %v1635_v21  ;;  %v1098_v12 = vpop.permute.xlu1 %1097 }
 0x119   :  { %v1093_v52 = vpop.permute.xlu0 %1092 }
 0x11b   :  { %1638 = vmatpush3.bf16.msra.mxu0 %v1635_v21 }
 0x11e   :  { %1561 = vmatmul.mubr.msk.f32.vlgmr.msra.gmra.mrb[12].mxu0 %vm1120_vm6, %v1009_v22 }
 0x11f   :  { %1563 = vmatprep.mubr.msk.f32.mxu0 %vm1120_vm6, %v1010_v23 }
 0x122   :  { %1564 = vmatmul.mubr.msk.f32.gmra.mrb[14].mxu0 %vm1120_vm6, %v1011_v25  ;;  %v1108_v25 = vpop.permute.xlu1 %1107 }
 0x123   :  { %1566 = vmatprep.mubr.msk.f32.mxu0 %vm1120_vm6, %v1012_v27 }
 0x126   :  { %1567 = vmatmul.mubr.msk.f32.gmra.mrb[16].mxu0 %vm1120_vm6, %v1013_v28 }
 0x127   :  { %1569 = vmatprep.mubr.msk.f32.mxu0 %vm1120_vm6, %v1014_v24  ;;  %v1103_v24 = vpop.permute.xlu0 %1102 }
 0x12a   :  { %1570 = vmatmul.mubr.msk.f32.gmra.mrb[18].mxu0 %vm1120_vm6, %v1015_v29 }
 0x12b   :  { %1572 = vmatprep.mubr.msk.f32.mxu0 %vm1120_vm6, %v1016_v30 }
 0x12e   :  { %1573 = vmatmul.mubr.msk.f32.gmra.mrb[20].mxu0 %vm1120_vm6, %v1017_v31 }
 0x12f   :  { %1575 = vmatprep.mubr.msk.f32.mxu0 %vm1120_vm6, %v1018_v32 }
 0x132   :  { %1576 = vmatmul.mubr.msk.f32.gmra.mrb[22].mxu0 %vm1120_vm6, %v1019_v33 }
 0x133   :  { %1578 = vmatprep.mubr.msk.f32.mxu0 %vm1120_vm6, %v1020_v35 }
 0x136   :  { %1579 = vmatmul.mubr.msk.f32.gmra.mrb[24].mxu0 %vm1120_vm6, %v1021_v36 }
 0x137   :  { %1581 = vmatprep.mubr.msk.f32.mxu0 %vm1120_vm6, %v1022_v38 }
 0x13a   :  { %1582 = vmatmul.mubr.msk.f32.gmra.mrb[26].mxu0 %vm1120_vm6, %v1023_v26  ;;  %v1118_v26 = vpop.permute.xlu1 %1117 }
 0x1f1   :  { %v1562_v46 = vpop.f32.mrb[12].mxu0 }
 0x1f2   :  { %v1241_v48 = vadd.f32 %v1562_v46, %v1048_v41  ;;  %v1235_v49 = vpop.f32.mrb[13].mxu0 }
 0x1f3   :  { %v1236_v50 = vadd.f32 %v1235_v49, %v1043_v42 }
 0x1f4   :  { %v1315_v51 = vmax.f32 %v1241_v48, 0.0 }
 0x1f5   :  { %v1314_v54 = vmax.f32 %v1236_v50, 0.0  ;;  %v1565_v55 = vpop.f32.mrb[14].mxu0 }
 0x1f6   :  { %v1251_v34 = vadd.f32 %v1565_v55, %v1058_v43  ;;  %v1245_v57 = vpop.f32.mrb[15].mxu0  ;;  %v1113_v43 = vpop.permute.xlu0 %1112 }
 0x1f7   :  { %v1640_v58 = vpack.c.bf16 %v1315_v51, %v1314_v54  ;;  %v1246_v59 = vadd.f32 %v1245_v57, %v1053_v44  ;;  %v1330_v51 = vld [vmem:[%s2065_s14] sm:$0x1] }
 0x1f8   :  { %v1317_v4 = vmax.f32 %v1251_v34, 0.0 }
 0x1f9   :  { %v1316_v60 = vmax.f32 %v1246_v59, 0.0  ;;  %v1568_v61 = vpop.f32.mrb[16].mxu0  ;;  %1641 = vmatpush3.bf16.msra.mxu1 %v1640_v58 }
 0x1fa   :  { %v1261_v62 = vadd.f32 %v1568_v61, %v1068_v45  ;;  %v1255_v63 = vpop.f32.mrb[17].mxu0  ;;  %1642 = vmatprep.subr.bf16.mxu1 %v1681_v39  ;;  %v1335_v54 = vpop.permute.xlu0 %1334 }
 0x1fb   :  { %v1643_v0 = vpack.c.bf16 %v1317_v4, %v1316_v60  ;;  %v1256_v1 = vadd.f32 %v1255_v63, %v1063_v40 }
 0x1fc   :  { %v1319_v3 = vmax.f32 %v1261_v62, 0.0 }
 0x1fd   :  { %v1318_v5 = vmax.f32 %v1256_v1, 0.0  ;;  %v1571_v6 = vpop.f32.mrb[18].mxu0  ;;  %1644 = vmatpush3.bf16.msra.mxu1 %v1643_v0 }
 0x1fe   :  { %v1271_v47 = vadd.f32 %v1571_v6, %v1078_v53  ;;  %v1265_v7 = vpop.f32.mrb[19].mxu0  ;;  %1645 = vmatprep.subr.bf16.mxu1 %v1681_v39  ;;  %v1339_v53 = vsub.s32 0, %v1779_v8 }
 0x1ff   :  { %v1646_v9 = vpack.c.bf16 %v1319_v3, %v1318_v5  ;;  %v1266_v10 = vadd.f32 %v1265_v7, %v1073_v56 }
 0x200   :  { %v1321_v11 = vmax.f32 %v1271_v47, 0.0  ;;  %v1340_v55 = vrot.slane %v1335_v54, %v1339_v53 }
 0x201   :  { %v1320_v13 = vmax.f32 %v1266_v10, 0.0  ;;  %v1574_v14 = vpop.f32.mrb[20].mxu0  ;;  %1647 = vmatpush3.bf16.msra.mxu1 %v1646_v9 }
 0x202   :  { %v1281_v15 = vadd.f32 %v1574_v14, %v1088_v37  ;;  %v1275_v17 = vpop.f32.mrb[21].mxu0  ;;  %1648 = vmatprep.subr.bf16.mxu1 %v1681_v39 }
 0x203   :  { %v1649_v18 = vpack.c.bf16 %v1321_v11, %v1320_v13  ;;  %v1276_v19 = vadd.f32 %v1275_v17, %v1083_v2 }
 0x204   :  { %v1323_v16 = vmax.f32 %v1281_v15, 0.0 }
 0x205   :  { %v1322_v20 = vmax.f32 %v1276_v19, 0.0  ;;  %v1577_v21 = vpop.f32.mrb[22].mxu0  ;;  %1650 = vmatpush3.bf16.msra.mxu1 %v1649_v18 }
 0x206   :  { %v1291_v22 = vadd.f32 %v1577_v21, %v1098_v12  ;;  %v1285_v23 = vpop.f32.mrb[23].mxu0  ;;  %1651 = vmatprep.subr.bf16.mxu1 %v1681_v39 }
 0x207   :  { %v1652_v27 = vpack.c.bf16 %v1323_v16, %v1322_v20  ;;  %v1286_v28 = vadd.f32 %v1285_v23, %v1093_v52 }
 0x208   :  { %v1325_v29 = vmax.f32 %v1291_v22, 0.0 }
 0x209   :  { %v1324_v30 = vmax.f32 %v1286_v28, 0.0  ;;  %v1580_v31 = vpop.f32.mrb[24].mxu0  ;;  %1653 = vmatpush3.bf16.msra.mxu1 %v1652_v27 }
 0x20a   :  { %v1301_v32 = vadd.f32 %v1580_v31, %v1108_v25  ;;  %v1295_v33 = vpop.f32.mrb[25].mxu0  ;;  %1654 = vmatprep.subr.bf16.mxu1 %v1681_v39 }
 0x20b   :  { %v1655_v35 = vpack.c.bf16 %v1325_v29, %v1324_v30  ;;  %v1296_v36 = vadd.f32 %v1295_v33, %v1103_v24 }
 0x20c   :  { %v1327_v38 = vmax.f32 %v1301_v32, 0.0 }
 0x20d   :  { %v1326_v41 = vmax.f32 %v1296_v36, 0.0  ;;  %v1583_v42 = vpop.f32.mrb[26].mxu0  ;;  %1656 = vmatpush3.bf16.msra.mxu1 %v1655_v35 }
 0x20e   :  { %v1311_v44 = vadd.f32 %v1583_v42, %v1118_v26  ;;  %v1305_v45 = vpop.f32.mrb[27].mxu0  ;;  %1657 = vmatprep.subr.bf16.mxu1 %v1681_v39 }
 0x20f   :  { %v1658_v40 = vpack.c.bf16 %v1327_v38, %v1326_v41  ;;  %v1306_v46 = vadd.f32 %v1305_v45, %v1113_v43 }
 0x210   :  { %v1329_v48 = vmax.f32 %v1311_v44, 0.0 }
 0x211   :  { %v1328_v49 = vmax.f32 %v1306_v46, 0.0  ;;  %1659 = vmatpush3.bf16.msra.mxu1 %v1658_v40 }
 0x212   :  { %1660 = vmatprep.subr.bf16.mxu1 %v1681_v39 }
 0x213   :  { %v1661_v50 = vpack.c.bf16 %v1329_v48, %v1328_v49 }
 0x215   :  { %1662 = vmatpush3.bf16.msra.mxu1 %v1661_v50 }
 0x218   :  { %1617 = vmatmul.mubr.f32.vlgmr.msra.gmra.mrb[22].mxu1 %v1330_v51 }
 0x2eb   :  { %v1407_v56 = vpop.f32.mrb[22].mxu1 }
 0x2ec   :  { %v1408_v34 = vadd.f32 %v1407_v56, %v1340_v55  ;;  %v1618_v57 = vpop.f32.mrb[23].mxu1 }
 0x2ee   :  { %v1475_v58 = vmul.f32 -1.442695, %v1408_v34 }
 0x2f0   :  { %1674 = vpow2.f32 %v1475_v58 }
 0x2fa   :  { %v1675_v59 = vpop.eup %1674 }
 0x2fb   :  { %v1414_v4 = vadd.f32 1.0, %v1675_v59 }
 0x2fd   :  { %1676 = vrcp.f32 %v1414_v4 }
 0x307   :  { %v1677_v39 = vpop.eup %1676 }
 0x308   :  { %1417 = vst [vmem:[%s2066_s16] sm:$0x1] %v1677_v39 }

</bundles_post_ra>
